<compile_context>
chip_gen: v5e
topology: v5e:2x2
jax: 0.10.0
libtpu: 0.0.40
codegen_flags: <defaults>
</compile_context>

<pallas_src>
import functools

import jax
import jax.numpy as jnp
from jax import lax
from jax.experimental import pallas as pl
from jax.experimental.pallas import tpu as pltpu


# ---------------------------------------------------------------------------
# helpers
# ---------------------------------------------------------------------------

def _round_up(n: int, m: int) -> int:
    return ((n + m - 1) // m) * m


def _vmem_limit_bytes() -> int:
    """VMEM limit derived from the actual chip; v7x-safe fallback."""
    try:
        cap = int(pltpu.get_tpu_info().vmem_capacity_bytes)
    except Exception:
        cap = 64 * 1024 * 1024   # v7x per-TC VMEM (smallest across v5e/v6e/v7x)
    return min(cap * 3 // 4, 96 * 1024 * 1024)


def _choose_batch_tile(batch: int, d: int, hp: int, vmem_limit: int) -> int:
    """Batch tile: multiple of 8, aims for >= 4 grid steps (2 TCs x 2 so each
    v7x core still double-buffers), capped at 512 rows and by a conservative
    VMEM working-set budget (sized for the RK4 kernel's live set)."""
    bp8 = _round_up(max(batch, 8), 8)
    tb = _round_up(pl.cdiv(bp8, 4), 8)
    # VMEM accounting with lane padding to 128: ~6 live d-wide f32 buffers
    # (x/out double buffers, carry, stage temporaries) + ~2 hp-wide buffers
    # (f32 + bf16 hidden activation) per batch row.
    dl = _round_up(d, 128)
    per_row = 4 * (6 * dl + 2 * hp)
    weight_bytes = 2 * (2 * d * hp) + 4 * (2 * hp + d)
    budget = max(vmem_limit // 2 - 2 * weight_bytes, 1 << 20)
    tb_cap = max(8, (budget // per_row) // 8 * 8)
    tb = max(8, min(tb, tb_cap, 512))
    return min(tb, bp8)


def _prepare_params(w1x, w1t, b1, w2, b2):
    """Pad only the hidden dim (VMEM-resident) to a multiple of 128; bf16
    matmul weights, f32 biases.  Padding is exact (see header)."""
    d, h = w1x.shape
    hp = _round_up(h, 128)
    w1x_p = jnp.pad(w1x.astype(jnp.float32), ((0, 0), (0, hp - h))).astype(jnp.bfloat16)
    w1t_p = jnp.pad(w1t.astype(jnp.float32).reshape(1, h), ((0, 0), (0, hp - h)))
    b1_p = jnp.pad(b1.astype(jnp.float32).reshape(1, h), ((0, 0), (0, hp - h)))
    w2_p = jnp.pad(w2.astype(jnp.float32), ((0, hp - h), (0, 0))).astype(jnp.bfloat16)
    b2_p = b2.astype(jnp.float32).reshape(1, d)
    return (d, h, hp), (w1x_p, w1t_p, b1_p, w2_p, b2_p)


def _weight_specs(d: int, hp: int):
    # Constant index_maps -> weight blocks are fetched once and stay resident
    # across the whole batch grid.
    return [
        pl.BlockSpec((d, hp), lambda i: (0, 0)),    # w1x  bf16
        pl.BlockSpec((1, hp), lambda i: (0, 0)),    # w1t  f32
        pl.BlockSpec((1, hp), lambda i: (0, 0)),    # b1   f32
        pl.BlockSpec((hp, d), lambda i: (0, 0)),    # w2   bf16
        pl.BlockSpec((1, d), lambda i: (0, 0)),     # b2   f32
    ]


def _compiler_params(vmem_limit: int):
    return pltpu.CompilerParams(
        dimension_semantics=("parallel",),    # batch axis: shard across TCs
        vmem_limit_bytes=vmem_limit,
    )


# ---------------------------------------------------------------------------
# single vector-field evaluation kernel (DEFuncBase.forward hot path)
# ---------------------------------------------------------------------------

def _defunc_vf_kernel(t_ref, x_ref, w1x_ref, w1t_ref, b1_ref, w2_ref, b2_ref,
                      o_ref):
    # t_ref:  SMEM (1,) f32       x_ref: VMEM (TB, D)  (unpadded features)
    # w1x (D, Hp) bf16 / w1t (1, Hp) f32 / b1 (1, Hp) f32
    # w2  (Hp, D) bf16 / b2 (1, D) f32          o_ref: (TB, D)
    t = t_ref[0]
    b1_eff = t * w1t_ref[...] + b1_ref[...]          # (1, Hp) — in-kernel, TC-safe

    h = jnp.dot(x_ref[...].astype(jnp.bfloat16), w1x_ref[...],
                preferred_element_type=jnp.float32)
    h = jnp.tanh(h + b1_eff)
    out = jnp.dot(h.astype(jnp.bfloat16), w2_ref[...],
                  preferred_element_type=jnp.float32) + b2_ref[...]
    o_ref[...] = out.astype(o_ref.dtype)


def make_vector_field(w1x, w1t, b1, w2, b2):
    """Returns vf(t, x): one fused, batch-tiled Pallas evaluation of the MLP
    vector field.  x stays unpadded in HBM (only batch rows are padded to the
    tile size)."""
    (d, _h, hp), params = _prepare_params(w1x, w1t, b1, w2, b2)
    w1x_p, w1t_p, b1_p, w2_p, b2_p = params
    vmem_limit = _vmem_limit_bytes()

    def vf(t, x):
        batch, d_in = x.shape
        if d_in != d:
            raise ValueError(f"expected x feature dim {d}, got {d_in}")
        t_arr = jnp.asarray(t, dtype=jnp.float32).reshape((1,))

        tb = _choose_batch_tile(batch, d, hp, vmem_limit)
        bp = _round_up(batch, tb)
        x_in = x if bp == batch else jnp.pad(x, ((0, bp - batch), (0, 0)))

        out = pl.pallas_call(
            _defunc_vf_kernel,
            out_shape=jax.ShapeDtypeStruct((bp, d), x.dtype),
            grid=(bp // tb,),
            in_specs=[
                pl.BlockSpec(memory_space=pltpu.MemorySpace.SMEM),   # t
                pl.BlockSpec((tb, d), lambda i: (i, 0)),             # x tile
            ] + _weight_specs(d, hp),
            out_specs=pl.BlockSpec((tb, d), lambda i: (i, 0)),
            compiler_params=_compiler_params(vmem_limit),
        )(t_arr, x_in, w1x_p, w1t_p, b1_p, w2_p, b2_p)
        return out if bp == batch else out[:batch]

    return vf


# ---------------------------------------------------------------------------
# fused N-step RK4 integrator: the whole fixed-step loop in ONE pallas_call.
# State lives in the f32 output VMEM block; HBM is touched once per tile.
# ---------------------------------------------------------------------------

def _rk4_integrate_kernel(sched_ref, x_ref, w1x_ref, w1t_ref, b1_ref, w2_ref,
                          b2_ref, o_ref, *, n_steps: int):
    t0 = sched_ref[0]
    dt = sched_ref[1]
    w1x = w1x_ref[...]
    w1t = w1t_ref[...]
    b1 = b1_ref[...]
    w2 = w2_ref[...]
    b2 = b2_ref[...]

    def vf(tt, xx):
        h = jnp.dot(xx.astype(jnp.bfloat16), w1x,
                    preferred_element_type=jnp.float32)
        h = jnp.tanh(h + tt * w1t + b1)
        return jnp.dot(h.astype(jnp.bfloat16), w2,
                       preferred_element_type=jnp.float32) + b2

    # f32 state carried in the output VMEM block; written back to HBM once.
    o_ref[...] = x_ref[...].astype(jnp.float32)

    def step(k, carry):
        t = t0 + k.astype(jnp.float32) * dt
        x = o_ref[...]
        # Running-accumulator RK4: only {x, acc, k_i} live at any point.
        k1 = vf(t, x)
        acc = x + (dt / 6.0) * k1
        k2 = vf(t + 0.5 * dt, x + (0.5 * dt) * k1)
        acc = acc + (dt / 3.0) * k2
        k3 = vf(t + 0.5 * dt, x + (0.5 * dt) * k2)
        acc = acc + (dt / 3.0) * k3
        k4 = vf(t + dt, x + dt * k3)
        o_ref[...] = acc + (dt / 6.0) * k4
        return carry

    lax.fori_loop(0, n_steps, step, jnp.int32(0))


def make_rk4_integrator(w1x, w1t, b1, w2, b2, n_steps: int):
    """Returns integrate(t0, dt, x): n_steps classic RK4 steps with weights
    resident and the state never leaving VMEM between steps.  Output is f32."""
    (d, _h, hp), params = _prepare_params(w1x, w1t, b1, w2, b2)
    w1x_p, w1t_p, b1_p, w2_p, b2_p = params
    vmem_limit = _vmem_limit_bytes()
    kernel = functools.partial(_rk4_integrate_kernel, n_steps=int(n_steps))

    def integrate(t0, dt, x):
        batch, d_in = x.shape
        if d_in != d:
            raise ValueError(f"expected x feature dim {d}, got {d_in}")
        sched = jnp.stack([jnp.asarray(t0, jnp.float32).reshape(()),
                           jnp.asarray(dt, jnp.float32).reshape(())])

        tb = _choose_batch_tile(batch, d, hp, vmem_limit)
        bp = _round_up(batch, tb)
        x_in = x if bp == batch else jnp.pad(x, ((0, bp - batch), (0, 0)))

        out = pl.pallas_call(
            kernel,
            out_shape=jax.ShapeDtypeStruct((bp, d), jnp.float32),
            grid=(bp // tb,),
            in_specs=[
                pl.BlockSpec(memory_space=pltpu.MemorySpace.SMEM),   # [t0, dt]
                pl.BlockSpec((tb, d), lambda i: (i, 0)),             # x tile
            ] + _weight_specs(d, hp),
            out_specs=pl.BlockSpec((tb, d), lambda i: (i, 0)),
            compiler_params=_compiler_params(vmem_limit),
        )(sched, x_in, w1x_p, w1t_p, b1_p, w2_p, b2_p)
        return out if bp == batch else out[:batch]

    return integrate


# ---------------------------------------------------------------------------
# DEFuncBase wrapper (same semantics as the torchdyn module)
# ---------------------------------------------------------------------------

class DEFuncBase:
    """JAX/Pallas analogue of torchdyn's DEFuncBase wrapper."""

    def __init__(self, vector_field, has_time_arg: bool = True):
        self.nfe = 0.0
        self.vf = vector_field
        self.has_time_arg = has_time_arg

    def __call__(self, t, x):
        # TODO(synk): nfe is a Python-side counter; under jax.jit / lax.scan it
        # counts traces, not device evaluations (torchdyn counts eager calls).
        self.nfe += 1
        if self.has_time_arg:
            return self.vf(t, x)
        return self.vf(x)


# ---------------------------------------------------------------------------
# references (mirror the kernel's bf16 matmul inputs / f32 accumulation)
# ---------------------------------------------------------------------------

def _bf16(v):
    return v.astype(jnp.bfloat16).astype(jnp.float32)


def _reference_vf(t, x, w1x, w1t, b1, w2, b2):
    h = jnp.tanh(_bf16(x) @ _bf16(w1x) + t * w1t + b1)
    return _bf16(h) @ _bf16(w2) + b2


def _reference_rk4_integrate(t0, dt, n_steps, x, w1x, w1t, b1, w2, b2):
    vf = functools.partial(_reference_vf, w1x=w1x, w1t=w1t, b1=b1, w2=w2, b2=b2)
    x = x.astype(jnp.float32)
    for k in range(n_steps):
        t = t0 + k * dt
        k1 = vf(t, x)
        k2 = vf(t + 0.5 * dt, x + 0.5 * dt * k1)
        k3 = vf(t + 0.5 * dt, x + 0.5 * dt * k2)
        k4 = vf(t + dt, x + dt * k3)
        x = x + (dt / 6.0) * (k1 + 2.0 * k2 + 2.0 * k3 + k4)
    return x


# ---------------------------------------------------------------------------
# demo / self-check
# ---------------------------------------------------------------------------

if __name__ == "__main__":
    key = jax.random.PRNGKey(0)
    B, D, H = 8, 16, 32  # batch, state dim, hidden dim

    k_x, k_xb, k_w1, k_w1t, k_b1, k_w2, k_b2 = jax.random.split(key, 7)
    x = jax.random.normal(k_x, (B, D), dtype=jnp.float32)
    t = jnp.float32(0.5)

    w1x = jax.random.normal(k_w1, (D, H), dtype=jnp.float32) * 0.1
    w1t = jax.random.normal(k_w1t, (1, H), dtype=jnp.float32) * 0.1
    b1 = jax.random.normal(k_b1, (1, H), dtype=jnp.float32) * 0.1
    w2 = jax.random.normal(k_w2, (H, D), dtype=jnp.float32) * 0.1
    b2 = jax.random.normal(k_b2, (1, D), dtype=jnp.float32) * 0.1

    # --- single evaluation through the DEFuncBase wrapper -------------------
    vf = make_vector_field(w1x, w1t, b1, w2, b2)
    defunc = DEFuncBase(vf, has_time_arg=True)

    out = jax.block_until_ready(defunc(t, x))
    ref = _reference_vf(t, x, w1x, w1t, b1, w2, b2)
    assert out.shape == (B, D)
    assert jnp.allclose(out, ref, atol=2e-3, rtol=2e-3), "vf mismatch vs reference"

    # --- larger batch: exercises row padding + multi-step parallel grid -----
    B2 = 1000
    x_big = jax.random.normal(k_xb, (B2, D), dtype=jnp.float32)
    out_big = jax.block_until_ready(defunc(t, x_big))
    ref_big = _reference_vf(t, x_big, w1x, w1t, b1, w2, b2)
    assert out_big.shape == (B2, D)
    assert defunc.nfe == 2.0
    assert jnp.allclose(out_big, ref_big, atol=2e-3, rtol=2e-3), "tiled vf mismatch"

    # --- fused N-step RK4 integration: one launch, state never leaves VMEM --
    N_STEPS = 8
    dt = jnp.float32(0.1)
    integrate = make_rk4_integrator(w1x, w1t, b1, w2, b2, n_steps=N_STEPS)
    x_final = jax.block_until_ready(integrate(t, dt, x))
    ref_final = _reference_rk4_integrate(t, dt, N_STEPS, x, w1x, w1t, b1, w2, b2)
    assert x_final.shape == (B, D)
    assert jnp.allclose(x_final, ref_final, atol=5e-3, rtol=5e-3), "rk4 integrate mismatch"

    print("KERNEL_OK")
</pallas_src>

<mosaic_0001>
module attributes {stable_mosaic.version = 11 : i64} {
  func.func @_defunc_vf_kernel(%arg0: i32, %arg1: memref<1xf32, #tpu.memory_space<smem>>, %arg2: memref<8x16xf32, #tpu.memory_space<vmem>>, %arg3: memref<16x128xbf16, #tpu.memory_space<vmem>>, %arg4: memref<1x128xf32, #tpu.memory_space<vmem>>, %arg5: memref<1x128xf32, #tpu.memory_space<vmem>>, %arg6: memref<128x16xbf16, #tpu.memory_space<vmem>>, %arg7: memref<1x16xf32, #tpu.memory_space<vmem>>, %arg8: memref<8x16xf32, #tpu.memory_space<vmem>>) attributes {dimension_semantics = [#tpu.dimension_semantics<parallel>], iteration_bounds = array<i64: 1>, scalar_prefetch = 0 : i64, scratch_operands = 0 : i64, tpu.core_type = #tpu.core_type<tc>, window_params = [{transform_indices = @transform_0, window_bounds = array<i64: 1>}, {transform_indices = @transform_1, window_bounds = array<i64: 8, 16>}, {pipeline_mode = #tpu.pipeline_mode<synchronous>, transform_indices = @transform_2, window_bounds = array<i64: 16, 128>}, {pipeline_mode = #tpu.pipeline_mode<synchronous>, transform_indices = @transform_3, window_bounds = array<i64: 1, 128>}, {pipeline_mode = #tpu.pipeline_mode<synchronous>, transform_indices = @transform_4, window_bounds = array<i64: 1, 128>}, {pipeline_mode = #tpu.pipeline_mode<synchronous>, transform_indices = @transform_5, window_bounds = array<i64: 128, 16>}, {pipeline_mode = #tpu.pipeline_mode<synchronous>, transform_indices = @transform_6, window_bounds = array<i64: 1, 16>}, {transform_indices = @transform_7, window_bounds = array<i64: 8, 16>}]} {
    %c0 = arith.constant 0 : index
    %0 = memref.load %arg1[%c0] : memref<1xf32, #tpu.memory_space<smem>>
    %c0_0 = arith.constant 0 : index
    %c0_1 = arith.constant 0 : index
    %1 = vector.load %arg4[%c0_0, %c0_1] : memref<1x128xf32, #tpu.memory_space<vmem>>, vector<1x128xf32>
    %2 = vector.broadcast %0 : f32 to vector<1x128xf32>
    %3 = arith.mulf %2, %1 : vector<1x128xf32>
    %c0_2 = arith.constant 0 : index
    %c0_3 = arith.constant 0 : index
    %4 = vector.load %arg5[%c0_2, %c0_3] : memref<1x128xf32, #tpu.memory_space<vmem>>, vector<1x128xf32>
    %5 = arith.addf %3, %4 : vector<1x128xf32>
    %c0_4 = arith.constant 0 : index
    %c0_5 = arith.constant 0 : index
    %6 = vector.load %arg2[%c0_4, %c0_5] : memref<8x16xf32, #tpu.memory_space<vmem>>, vector<8x16xf32>
    %7 = arith.truncf %6 : vector<8x16xf32> to vector<8x16xbf16>
    %c0_6 = arith.constant 0 : index
    %c0_7 = arith.constant 0 : index
    %8 = vector.load %arg3[%c0_6, %c0_7] : memref<16x128xbf16, #tpu.memory_space<vmem>>, vector<16x128xbf16>
    %cst = arith.constant dense<0.000000e+00> : vector<8x128xf32>
    %9 = tpu.matmul %7, %8, %cst {dimension_numbers = #tpu.dot_dimension_numbers<[1], [0], [0], [1], [0, 0, 1, 1], [], []>} : vector<8x16xbf16>, vector<16x128xbf16>, vector<8x128xf32> -> vector<8x128xf32>
    %10 = vector.broadcast %5 : vector<1x128xf32> to vector<8x128xf32>
    %11 = arith.addf %9, %10 : vector<8x128xf32>
    %12 = math.tanh %11 : vector<8x128xf32>
    %13 = arith.truncf %12 : vector<8x128xf32> to vector<8x128xbf16>
    %c0_8 = arith.constant 0 : index
    %c0_9 = arith.constant 0 : index
    %14 = vector.load %arg6[%c0_8, %c0_9] : memref<128x16xbf16, #tpu.memory_space<vmem>>, vector<128x16xbf16>
    %cst_10 = arith.constant dense<0.000000e+00> : vector<8x16xf32>
    %15 = tpu.matmul %13, %14, %cst_10 {dimension_numbers = #tpu.dot_dimension_numbers<[1], [0], [0], [1], [0, 0, 1, 1], [], []>} : vector<8x128xbf16>, vector<128x16xbf16>, vector<8x16xf32> -> vector<8x16xf32>
    %c0_11 = arith.constant 0 : index
    %c0_12 = arith.constant 0 : index
    %16 = vector.load %arg7[%c0_11, %c0_12] : memref<1x16xf32, #tpu.memory_space<vmem>>, vector<1x16xf32>
    %17 = vector.broadcast %16 : vector<1x16xf32> to vector<8x16xf32>
    %18 = arith.addf %15, %17 : vector<8x16xf32>
    %c0_13 = arith.constant 0 : index
    %c0_14 = arith.constant 0 : index
    %19 = vector.load %arg8[%c0_13, %c0_14] : memref<8x16xf32, #tpu.memory_space<vmem>>, vector<8x16xf32>
    tpu.vector_store %arg8[%c0_13, %c0_14], %18 {strides = array<i32>} : memref<8x16xf32, #tpu.memory_space<vmem>>, vector<8x16xf32>,
    return
  }
  func.func @transform_0(%arg0: i32) -> i32 {
    %c0_i32 = arith.constant 0 : i32
    %c0_i32_0 = arith.constant 0 : i32
    return %c0_i32 : i32
  }
  func.func @transform_1(%arg0: i32) -> (i32, i32) {
    %c0_i32 = arith.constant 0 : i32
    %c0_i32_0 = arith.constant 0 : i32
    return %arg0, %c0_i32 : i32, i32
  }
  func.func @transform_2(%arg0: i32) -> (i32, i32) {
    %c0_i32 = arith.constant 0 : i32
    %c0_i32_0 = arith.constant 0 : i32
    %c0_i32_1 = arith.constant 0 : i32
    return %c0_i32, %c0_i32_0 : i32, i32
  }
  func.func @transform_3(%arg0: i32) -> (i32, i32) {
    %c0_i32 = arith.constant 0 : i32
    %c0_i32_0 = arith.constant 0 : i32
    %c0_i32_1 = arith.constant 0 : i32
    return %c0_i32, %c0_i32_0 : i32, i32
  }
  func.func @transform_4(%arg0: i32) -> (i32, i32) {
    %c0_i32 = arith.constant 0 : i32
    %c0_i32_0 = arith.constant 0 : i32
    %c0_i32_1 = arith.constant 0 : i32
    return %c0_i32, %c0_i32_0 : i32, i32
  }
  func.func @transform_5(%arg0: i32) -> (i32, i32) {
    %c0_i32 = arith.constant 0 : i32
    %c0_i32_0 = arith.constant 0 : i32
    %c0_i32_1 = arith.constant 0 : i32
    return %c0_i32, %c0_i32_0 : i32, i32
  }
  func.func @transform_6(%arg0: i32) -> (i32, i32) {
    %c0_i32 = arith.constant 0 : i32
    %c0_i32_0 = arith.constant 0 : i32
    %c0_i32_1 = arith.constant 0 : i32
    return %c0_i32, %c0_i32_0 : i32, i32
  }
  func.func @transform_7(%arg0: i32) -> (i32, i32) {
    %c0_i32 = arith.constant 0 : i32
    %c0_i32_0 = arith.constant 0 : i32
    return %arg0, %c0_i32 : i32, i32
  }
}

</mosaic_0001>

<bundles_post_ra>
// kernel: tpu_custom_call.1
= control target key start
LH: loop header
LB: loop body
LE: loop exit
PB: predicated region body
PF: predicated region fallthrough
CT: control target
= control target key end

     0   :  { %vm48_vm0 = vcmask 130048   ;;  %s329_s0 = inlined_call_operand.<no memory space> [shape: f32[1], index: 0, kind: input, shape index: {}]   ;;  %s330_s1 = inlined_call_operand.vmem [shape: f32[8,16], index: 1, kind: input, shape index: {}]   ;;  %s331_s2 = inlined_call_operand.vmem [shape: bf16[16,128], index: 2, kind: input, shape index: {}]   ;;  %s332_s3 = inlined_call_operand.vmem [shape: f32[1,128], index: 3, kind: input, shape index: {}]   ;;  %s333_s4 = inlined_call_operand.vmem [shape: f32[1,128], index: 4, kind: input, shape index: {}]   ;;  %s334_s5 = inlined_call_operand.vmem [shape: bf16[128,16], index: 5, kind: input, shape index: {}]   ;;  %s335_s6 = inlined_call_operand.vmem [shape: f32[1,16], index: 6, kind: input, shape index: {}]   ;;  %s336_s7 = inlined_call_operand.hbm [shape: f32[8,16], index: 7, kind: output, shape index: {}]  }
   0x1   :  { %v202_v0 = vld [vmem:[%s331_s2] sm:$0xff]  ;;  %v210_v2 = vld [vmem:[%s334_s5 + $0x38] sm:$0xff]  ;;  %v209_v4 = vld [vmem:[%s334_s5 + $0x30] sm:$0xff] }
   0x2   :  { %v35_v1 = vld [vmem:[%s330_s1] sm:$0xff]  ;;  %59 = vmatpush.bf16.msra.mxu0 %v202_v0  ;;  %135 = vmatpush.bf16.msra.mxu1 %v210_v2 }
   0x3   :  { %v36_v3 = vpack.c.bf16 %v35_v1, %v35_v1 }
   0x4   :  { %13 = vsyncpa [#allocation4], 0  ;;  %v208_v5 = vld [vmem:[%s334_s5 + $0x28] sm:$0xff]  ;;  %v207_v6 = vld [vmem:[%s334_s5 + $0x20] sm:$0xff]  ;;  %v31_v12 = vstv %s329_s0  ;;  %s241_s25 = smov [#allocation3]   ;;  %s156_s28 = sshll.u32 %s336_s7, 4  ;;  %s157_s28 = int_to_ptr.hbm [resolvable:$true] %s156_s28 }
   0x5   :  { %169 = vmatmul.msk.bf16.vlgmr.msra.gmra.mxu0 %vm48_vm0, %v36_v3  ;;  %v206_v7 = vld [vmem:[%s334_s5 + $0x18] sm:$0xff]  ;;  %v205_v8 = vld [vmem:[%s334_s5 + $0x10] sm:$0xff]  ;;  %v204_v9 = vld [vmem:[%s334_s5 + $0x8] sm:$0xff]  ;;  %s154_s0 = sshll.u32 %s241_s25, 4  ;;  %s155_s0 = int_to_ptr.vmem [resolvable:$true] %s154_s0 }
   0x6   :  { %136 = vmatpush.bf16.msra.mxu1 %v209_v4  ;;  %v203_v10 = vld [vmem:[%s334_s5] sm:$0xff] }
   0x7   :  { %v30_v11 = vld [vmem:[%s332_s3] sm:$0x1] }
   0x8   :  { %v32_v13 = vmul.f32 %v31_v12, %v30_v11  ;;  %v33_v14 = vld [vmem:[%s333_s4] sm:$0x1] }
   0x9   :  { %v212_v22 = vld [vmem:[%s335_s6] ss:$0 sm:$0xff] }
   0xa   :  { %137 = vmatpush.bf16.msra.mxu1 %v208_v5  ;;  %v34_v15 = vadd.f32 %v33_v14, %v32_v13 }
   0xc   :  { %v40_v16 = vperm.slane %v34_v15, 0 }
   0xe   :  { %138 = vmatpush.bf16.msra.mxu1 %v207_v6 }
  0x12   :  { %139 = vmatpush.bf16.msra.mxu1 %v206_v7 }
  0x16   :  { %140 = vmatpush.bf16.msra.mxu1 %v205_v8 }
  0x1a   :  { %141 = vmatpush.bf16.msra.mxu1 %v204_v9 }
  0x1e   :  { %142 = vmatpush.bf16.msra.mxu1 %v203_v10 }
  0x82   :  { %v61_v17 = vpop.f32.mrf.mxu0 }
  0x83   :  { %v62_v18 = vadd.f32 %v61_v17, %v40_v16 }
  0x85   :  { %213 = vtanh.f32 %v62_v18 }
  0x8a   :  { %v63_v19 = vpop.f32.mrf.mxu0 }
  0x8b   :  { %v214_v20 = vpop.eup %213 }
  0x8c   :  { %v66_v21 = vpack.c.bf16 %v214_v20, %v214_v20 }
  0x8e   :  { %143 = vmatmul.bf16.vlgmr.msra.gmra.mxu1 %v66_v21 }
 0x10b   :  { %v144_v23 = vpop.f32.mrf.mxu1 }
 0x10c   :  { %v145_v24 = vadd.f32 %v212_v22, %v144_v23 }
 0x10e   :  { %148 = vst.msk [vmem:[#allocation3] sm:$0xff] %vm48_vm0, %v145_v24 }
 0x10f   :  { %159 = dma.vmem_to_hbm [thread:$0]  %s155_s0, 128, %s157_s28, [#allocation4]  }
 0x113   :  { %v146_v25 = vpop.f32.mrf.mxu1 }
 0x114   :  { %239 = dma.done.wait [#allocation4], 128  }
 0x115   :  { %240 = vsyncadd [#allocation4], 4294967168 }
 0x116   :  { %164 = vsyncpa [#allocation4], 1 }

</bundles_post_ra>
